<compile_context>
chip_gen: v7x
topology: tpu7x:2x2x1
jax: 0.10.0
libtpu: 0.0.40
codegen_flags: <defaults>
</compile_context>

<pallas_src>
import jax
import jax.numpy as jnp
from jax.experimental import pallas as pl
from jax.experimental.pallas import tpu as pltpu

IN_DIM = 8
H1 = 128
H2 = 128
H3 = 64
HEAD_DIM = 9       # 4 mean + 4 log_std + 1 value (real columns of fused head)
HEAD_PAD = 16      # narrow fused-head width (only 64 B/row of writeback)
BIAS_PAD = 512     # packed biases: b1@[0:128] b2@[128:256] b3@[256:320] bh@[384:400]
MAX_TB = 1024      # batch tile; sweep 512-2048 (v5e: <=2048, v7x: fits 64 MiB easily)
VMEM_LIMIT = 32 * 1024 * 1024  # explicit scoped-VMEM limit, safe on v5e/v6e/v7x


def policy_kernel(x_ref, w1_ref, w2_ref, w3_ref, wh_ref, b_ref, out_ref):
    """Fused actor-critic MLP: 3x (Linear+ReLU) + one fused 3-head Linear.

    Matmul operands are cast to the weight dtype (f32 or bf16); accumulation,
    bias add and ReLU stay in f32 on all generations.
    """
    cdt = w1_ref.dtype
    x = x_ref[...].astype(cdt)

    # Static, 128-lane-aligned slices of the packed bias row (no runtime cost).
    b1 = b_ref[:, 0:H1]
    b2 = b_ref[:, 128:128 + H2]
    b3 = b_ref[:, 256:256 + H3]
    bh = b_ref[:, 384:384 + HEAD_PAD]

    h = jnp.maximum(
        jnp.dot(x, w1_ref[...], preferred_element_type=jnp.float32) + b1, 0.0)
    h = jnp.maximum(
        jnp.dot(h.astype(cdt), w2_ref[...],
                preferred_element_type=jnp.float32) + b2, 0.0)
    h = jnp.maximum(
        jnp.dot(h.astype(cdt), w3_ref[...],
                preferred_element_type=jnp.float32) + b3, 0.0)

    # Single fused head matmul: one MXU push, one narrow (TB, 16) store.
    out_ref[...] = (jnp.dot(h.astype(cdt), wh_ref[...],
                            preferred_element_type=jnp.float32)
                    + bh).astype(out_ref.dtype)


def _num_tensorcores():
    """Best-effort count of TensorCores sharing the grid (megacore / v7x)."""
    try:
        kind = jax.devices()[0].device_kind.lower()
    except Exception:  # pragma: no cover - defensive
        return 1
    return 2 if any(t in kind for t in ("v7", "v4", "v5p")) else 1


def policy_forward(x, packed_params, *, max_tb=MAX_TB):
    """x: (B, 8) f32. Returns (mean (B,4), log_std (B,4), value (B,1))."""
    w1, w2, w3, wh, b_packed = packed_params
    B = x.shape[0]

    # Batch tile selection:
    #  * B <= max_tb: one full-size tile (block dim == array dim is always
    #    legal), except on multi-TC chips where we halve it (rounded up to a
    #    multiple of 8) so grid=(2,) and both cores get work.
    #  * B > max_tb: tile of max_tb rows (multiple of 8); Pallas masks the
    #    partial last tile.
    if B <= max_tb:
        TB = B
        if B > 8 and _num_tensorcores() >= 2:
            TB = (((B + 1) // 2 + 7) // 8) * 8
    else:
        TB = (max_tb // 8) * 8
    grid = (pl.cdiv(B, TB),)

    wbytes = jnp.dtype(w1.dtype).itemsize
    flops = 2 * B * (IN_DIM * H1 + H1 * H2 + H2 * H3 + H3 * HEAD_PAD)
    bytes_accessed = (4 * B * IN_DIM                                   # x read
                      + wbytes * (IN_DIM * H1 + H1 * H2 + H2 * H3
                                  + H3 * HEAD_PAD)                     # weights
                      + 4 * BIAS_PAD                                   # biases
                      + 4 * B * HEAD_PAD)                              # out write

    head = pl.pallas_call(
        policy_kernel,
        out_shape=jax.ShapeDtypeStruct((B, HEAD_PAD), jnp.float32),
        grid_spec=pltpu.PrefetchScalarGridSpec(
            num_scalar_prefetch=0,
            grid=grid,
            in_specs=[
                # x streams over the batch grid; weights/bias map to block
                # (0, 0) every step so they stay VMEM-resident.
                # (If profiling shows exposed DMA on the x/out streams, add
                #  pipeline_mode=pl.Buffered(3) to these two specs.)
                pl.BlockSpec((TB, IN_DIM), lambda i: (i, 0)),
                pl.BlockSpec((IN_DIM, H1), lambda i: (0, 0)),
                pl.BlockSpec((H1, H2), lambda i: (0, 0)),
                pl.BlockSpec((H2, H3), lambda i: (0, 0)),
                pl.BlockSpec((H3, HEAD_PAD), lambda i: (0, 0)),
                pl.BlockSpec((1, BIAS_PAD), lambda i: (0, 0)),
            ],
            out_specs=pl.BlockSpec((TB, HEAD_PAD), lambda i: (i, 0)),
        ),
        compiler_params=pltpu.CompilerParams(
            # Batch axis is independent -> shard across TCs (megacore / v7x).
            dimension_semantics=("parallel",),
            vmem_limit_bytes=VMEM_LIMIT,
        ),
        cost_estimate=pl.CostEstimate(
            flops=flops, transcendentals=0, bytes_accessed=bytes_accessed),
    )(x, w1, w2, w3, wh, b_packed)

    mean = head[:, 0:4]
    log_std = head[:, 4:8]
    value = head[:, 8:9]
    return mean, log_std, value


def init_raw_params(key):
    """Deterministic synthetic init mimicking nn.Linear shapes.
    Weights stored as (in, out); biases as (out,)."""
    dims = [(IN_DIM, H1), (H1, H2), (H2, H3), (H3, 4), (H3, 4), (H3, 1)]
    params = []
    for i, (fan_in, fan_out) in enumerate(dims):
        kw, kb = jax.random.split(jax.random.fold_in(key, i))
        bound = 1.0 / jnp.sqrt(fan_in)
        w = jax.random.uniform(kw, (fan_in, fan_out), jnp.float32, -bound, bound)
        b = jax.random.uniform(kb, (fan_out,), jnp.float32, -bound, bound)
        params.extend([w, b])
    return tuple(params)


def pack_params(raw, compute_dtype=jnp.float32):
    """Fuse head weights into one (64, 16) matrix and all biases into one
    (1, 512) lane-aligned f32 row.  Weights are stored in `compute_dtype`
    (use jnp.bfloat16 on v6e/v7x for ~3x fewer MXU passes; biases stay f32)."""
    (w1, b1, w2, b2, w3, b3, wm, bm, ws, bs, wv, bv) = raw

    wh = jnp.zeros((H3, HEAD_PAD), jnp.float32)
    wh = wh.at[:, 0:4].set(wm).at[:, 4:8].set(ws).at[:, 8:9].set(wv)

    bp = jnp.zeros((1, BIAS_PAD), jnp.float32)
    bp = (bp.at[0, 0:H1].set(b1)
            .at[0, 128:128 + H2].set(b2)
            .at[0, 256:256 + H3].set(b3)
            .at[0, 384:388].set(bm)
            .at[0, 388:392].set(bs)
            .at[0, 392:393].set(bv))

    cdt = jnp.dtype(compute_dtype)
    return (w1.astype(cdt), w2.astype(cdt), w3.astype(cdt), wh.astype(cdt), bp)


def policy_reference(x, raw):
    (w1, b1, w2, b2, w3, b3, wm, bm, ws, bs, wv, bv) = raw
    h = jnp.maximum(x @ w1 + b1[None, :], 0.0)
    h = jnp.maximum(h @ w2 + b2[None, :], 0.0)
    h = jnp.maximum(h @ w3 + b3[None, :], 0.0)
    return h @ wm + bm[None, :], h @ ws + bs[None, :], h @ wv + bv[None, :]


if __name__ == "__main__":
    key = jax.random.PRNGKey(0)
    kx, kp = jax.random.split(key)

    raw = init_raw_params(kp)
    packed_f32 = pack_params(raw, jnp.float32)
    packed_bf16 = pack_params(raw, jnp.bfloat16)

    fwd = jax.jit(policy_forward, static_argnames=("max_tb",))

    # 1) Small batch, exact f32 path (matches PyTorch semantics).
    B = 8
    x8 = jax.random.normal(kx, (B, IN_DIM), dtype=jnp.float32)
    mean, log_std, value = jax.block_until_ready(fwd(x8, packed_f32))
    mean_r, log_std_r, value_r = policy_reference(x8, raw)
    assert mean.shape == (B, 4) and log_std.shape == (B, 4) and value.shape == (B, 1)
    assert jnp.allclose(mean, mean_r, atol=1e-5)
    assert jnp.allclose(log_std, log_std_r, atol=1e-5)
    assert jnp.allclose(value, value_r, atol=1e-5)

    # 2) Multi-tile path with a partial last tile (small max_tb forces grid=4).
    x200 = jax.random.normal(jax.random.fold_in(kx, 1), (200, IN_DIM),
                             dtype=jnp.float32)
    m2, l2, v2 = jax.block_until_ready(fwd(x200, packed_f32, max_tb=64))
    m2r, l2r, v2r = policy_reference(x200, raw)
    assert jnp.allclose(m2, m2r, atol=1e-5)
    assert jnp.allclose(l2, l2r, atol=1e-5)
    assert jnp.allclose(v2, v2r, atol=1e-5)

    # 3) bf16-operand fast path (v6e/v7x MXU), f32 accumulation -> looser tol.
    m3, l3, v3 = jax.block_until_ready(fwd(x8, packed_bf16))
    assert jnp.allclose(m3, mean_r, atol=5e-2, rtol=5e-2)
    assert jnp.allclose(l3, log_std_r, atol=5e-2, rtol=5e-2)
    assert jnp.allclose(v3, value_r, atol=5e-2, rtol=5e-2)

    print("KERNEL_OK")
</pallas_src>

<mosaic_0001>
module attributes {stable_mosaic.version = 11 : i64} {
  func.func @policy_kernel(%arg0: i32, %arg1: memref<8x8xf32, #tpu.memory_space<vmem>>, %arg2: memref<8x128xf32, #tpu.memory_space<vmem>>, %arg3: memref<128x128xf32, #tpu.memory_space<vmem>>, %arg4: memref<128x64xf32, #tpu.memory_space<vmem>>, %arg5: memref<64x16xf32, #tpu.memory_space<vmem>>, %arg6: memref<1x512xf32, #tpu.memory_space<vmem>>, %arg7: memref<8x16xf32, #tpu.memory_space<vmem>>) attributes {dimension_semantics = [#tpu.dimension_semantics<parallel>], iteration_bounds = array<i64: 1>, scalar_prefetch = 0 : i64, scratch_operands = 0 : i64, tpu.core_type = #tpu.core_type<tc>, window_params = [{transform_indices = @transform_0, window_bounds = array<i64: 8, 8>}, {pipeline_mode = #tpu.pipeline_mode<synchronous>, transform_indices = @transform_1, window_bounds = array<i64: 8, 128>}, {pipeline_mode = #tpu.pipeline_mode<synchronous>, transform_indices = @transform_2, window_bounds = array<i64: 128, 128>}, {pipeline_mode = #tpu.pipeline_mode<synchronous>, transform_indices = @transform_3, window_bounds = array<i64: 128, 64>}, {pipeline_mode = #tpu.pipeline_mode<synchronous>, transform_indices = @transform_4, window_bounds = array<i64: 64, 16>}, {pipeline_mode = #tpu.pipeline_mode<synchronous>, transform_indices = @transform_5, window_bounds = array<i64: 1, 512>}, {transform_indices = @transform_6, window_bounds = array<i64: 8, 16>}]} {
    %c0 = arith.constant 0 : index
    %c0_0 = arith.constant 0 : index
    %0 = vector.load %arg1[%c0, %c0_0] : memref<8x8xf32, #tpu.memory_space<vmem>>, vector<8x8xf32>
    %c0_1 = arith.constant 0 : index
    %c0_2 = arith.constant 0 : index
    %1 = vector.load %arg6[%c0_1, %c0_2] : memref<1x512xf32, #tpu.memory_space<vmem>>, vector<1x128xf32>
    %c0_3 = arith.constant 0 : index
    %c128 = arith.constant 128 : index
    %2 = vector.load %arg6[%c0_3, %c128] : memref<1x512xf32, #tpu.memory_space<vmem>>, vector<1x128xf32>
    %c0_4 = arith.constant 0 : index
    %c256 = arith.constant 256 : index
    %3 = vector.load %arg6[%c0_4, %c256] : memref<1x512xf32, #tpu.memory_space<vmem>>, vector<1x64xf32>
    %c0_5 = arith.constant 0 : index
    %c384 = arith.constant 384 : index
    %4 = vector.load %arg6[%c0_5, %c384] : memref<1x512xf32, #tpu.memory_space<vmem>>, vector<1x16xf32>
    %c0_6 = arith.constant 0 : index
    %c0_7 = arith.constant 0 : index
    %5 = vector.load %arg2[%c0_6, %c0_7] : memref<8x128xf32, #tpu.memory_space<vmem>>, vector<8x128xf32>
    %cst = arith.constant dense<0.000000e+00> : vector<8x128xf32>
    %6 = tpu.matmul %0, %5, %cst {dimension_numbers = #tpu.dot_dimension_numbers<[1], [0], [0], [1], [0, 0, 1, 1], [], []>} : vector<8x8xf32>, vector<8x128xf32>, vector<8x128xf32> -> vector<8x128xf32>
    %7 = vector.broadcast %1 : vector<1x128xf32> to vector<8x128xf32>
    %8 = arith.addf %6, %7 : vector<8x128xf32>
    %cst_8 = arith.constant 0.000000e+00 : f32
    %9 = vector.broadcast %cst_8 : f32 to vector<8x128xf32>
    %10 = arith.maximumf %8, %9 : vector<8x128xf32>
    %c0_9 = arith.constant 0 : index
    %c0_10 = arith.constant 0 : index
    %11 = vector.load %arg3[%c0_9, %c0_10] : memref<128x128xf32, #tpu.memory_space<vmem>>, vector<128x128xf32>
    %cst_11 = arith.constant dense<0.000000e+00> : vector<8x128xf32>
    %12 = tpu.matmul %10, %11, %cst_11 {dimension_numbers = #tpu.dot_dimension_numbers<[1], [0], [0], [1], [0, 0, 1, 1], [], []>} : vector<8x128xf32>, vector<128x128xf32>, vector<8x128xf32> -> vector<8x128xf32>
    %13 = vector.broadcast %2 : vector<1x128xf32> to vector<8x128xf32>
    %14 = arith.addf %12, %13 : vector<8x128xf32>
    %cst_12 = arith.constant 0.000000e+00 : f32
    %15 = vector.broadcast %cst_12 : f32 to vector<8x128xf32>
    %16 = arith.maximumf %14, %15 : vector<8x128xf32>
    %c0_13 = arith.constant 0 : index
    %c0_14 = arith.constant 0 : index
    %17 = vector.load %arg4[%c0_13, %c0_14] : memref<128x64xf32, #tpu.memory_space<vmem>>, vector<128x64xf32>
    %cst_15 = arith.constant dense<0.000000e+00> : vector<8x64xf32>
    %18 = tpu.matmul %16, %17, %cst_15 {dimension_numbers = #tpu.dot_dimension_numbers<[1], [0], [0], [1], [0, 0, 1, 1], [], []>} : vector<8x128xf32>, vector<128x64xf32>, vector<8x64xf32> -> vector<8x64xf32>
    %19 = vector.broadcast %3 : vector<1x64xf32> to vector<8x64xf32>
    %20 = arith.addf %18, %19 : vector<8x64xf32>
    %cst_16 = arith.constant 0.000000e+00 : f32
    %21 = vector.broadcast %cst_16 : f32 to vector<8x64xf32>
    %22 = arith.maximumf %20, %21 : vector<8x64xf32>
    %c0_17 = arith.constant 0 : index
    %c0_18 = arith.constant 0 : index
    %23 = vector.load %arg5[%c0_17, %c0_18] : memref<64x16xf32, #tpu.memory_space<vmem>>, vector<64x16xf32>
    %cst_19 = arith.constant dense<0.000000e+00> : vector<8x16xf32>
    %24 = tpu.matmul %22, %23, %cst_19 {dimension_numbers = #tpu.dot_dimension_numbers<[1], [0], [0], [1], [0, 0, 1, 1], [], []>} : vector<8x64xf32>, vector<64x16xf32>, vector<8x16xf32> -> vector<8x16xf32>
    %25 = vector.broadcast %4 : vector<1x16xf32> to vector<8x16xf32>
    %26 = arith.addf %24, %25 : vector<8x16xf32>
    %c0_20 = arith.constant 0 : index
    %c0_21 = arith.constant 0 : index
    %27 = vector.load %arg7[%c0_20, %c0_21] : memref<8x16xf32, #tpu.memory_space<vmem>>, vector<8x16xf32>
    tpu.vector_store %arg7[%c0_20, %c0_21], %26 {strides = array<i32>} : memref<8x16xf32, #tpu.memory_space<vmem>>, vector<8x16xf32>,
    return
  }
  func.func @transform_0(%arg0: i32) -> (i32, i32) {
    %c0_i32 = arith.constant 0 : i32
    %c0_i32_0 = arith.constant 0 : i32
    return %arg0, %c0_i32 : i32, i32
  }
  func.func @transform_1(%arg0: i32) -> (i32, i32) {
    %c0_i32 = arith.constant 0 : i32
    %c0_i32_0 = arith.constant 0 : i32
    %c0_i32_1 = arith.constant 0 : i32
    return %c0_i32, %c0_i32_0 : i32, i32
  }
  func.func @transform_2(%arg0: i32) -> (i32, i32) {
    %c0_i32 = arith.constant 0 : i32
    %c0_i32_0 = arith.constant 0 : i32
    %c0_i32_1 = arith.constant 0 : i32
    return %c0_i32, %c0_i32_0 : i32, i32
  }
  func.func @transform_3(%arg0: i32) -> (i32, i32) {
    %c0_i32 = arith.constant 0 : i32
    %c0_i32_0 = arith.constant 0 : i32
    %c0_i32_1 = arith.constant 0 : i32
    return %c0_i32, %c0_i32_0 : i32, i32
  }
  func.func @transform_4(%arg0: i32) -> (i32, i32) {
    %c0_i32 = arith.constant 0 : i32
    %c0_i32_0 = arith.constant 0 : i32
    %c0_i32_1 = arith.constant 0 : i32
    return %c0_i32, %c0_i32_0 : i32, i32
  }
  func.func @transform_5(%arg0: i32) -> (i32, i32) {
    %c0_i32 = arith.constant 0 : i32
    %c0_i32_0 = arith.constant 0 : i32
    %c0_i32_1 = arith.constant 0 : i32
    return %c0_i32, %c0_i32_0 : i32, i32
  }
  func.func @transform_6(%arg0: i32) -> (i32, i32) {
    %c0_i32 = arith.constant 0 : i32
    %c0_i32_0 = arith.constant 0 : i32
    return %arg0, %c0_i32 : i32, i32
  }
}

</mosaic_0001>

<bundles_post_ra>
// kernel: policy_forward.1
= control target key start
LH: loop header
LB: loop body
LE: loop exit
PB: predicated region body
PF: predicated region fallthrough
CT: control target
= control target key end

     0   :  { %vm35_vm0 = vcmask 64512   ;;  %v598_v0 = vmov 0.0   ;;  %vm599_vm1 = vmmov 0   ;;  %v600_v4 = vmov 0.0|0.0   ;;  %s806_s1 = inlined_call_operand.vmem [shape: f32[8,128], index: 1, kind: input, shape index: {}]   ;;  %s807_s0 = inlined_call_operand.vmem [shape: f32[8,8], index: 0, kind: input, shape index: {}]   ;;  %s808_s2 = inlined_call_operand.vmem [shape: f32[128,128], index: 2, kind: input, shape index: {}]   ;;  %s809_s3 = inlined_call_operand.vmem [shape: f32[128,64], index: 3, kind: input, shape index: {}]   ;;  %s810_s5 = inlined_call_operand.vmem [shape: f32[1,512], index: 5, kind: input, shape index: {}]   ;;  %s811_s4 = inlined_call_operand.vmem [shape: f32[64,16], index: 4, kind: input, shape index: {}]   ;;  %s812_s6 = inlined_call_operand.vmem [shape: f32[8,16], index: 6, kind: output, shape index: {}]  }
   0x1   :  { %441 = vmatprep.subr.mxu0 %v598_v0  ;;  %v28_v1 = vld [vmem:[%s806_s1] sm:$0xff]  ;;  %443 = vmatprep.mubr.msk.f32.mxu0 %vm599_vm1, %v598_v0  ;;  %v111_v5 = vld [vmem:[%s808_s2 + $0x8] sm:$0xff]  ;;  %v112_v6 = vld [vmem:[%s808_s2 + $0x10] sm:$0xff]  ;;  %vm310_vm2 = vcmask 523264   ;;  %vm384_vm3 = vcmask 130048  }
   0x2   :  { %v23_v2 = vld [vmem:[%s807_s0] sm:$0xff]  ;;  %442 = vmatpush3.msra.mxu0 %v28_v1  ;;  %535 = vmatprep.subr.bf16.mxu1 %v600_v4  ;;  %v113_v7 = vld [vmem:[%s808_s2 + $0x18] sm:$0xff]  ;;  %v115_v11 = vld [vmem:[%s808_s2 + $0x28] sm:$0xff] }
   0x3   :  { %v110_v3 = vld [vmem:[%s808_s2] sm:$0xff]  ;;  %444 = vmatmul.mubr.msk.f32.vlgmr.msra.gmra.mrb[0].mxu0 %vm35_vm0, %v23_v2  ;;  %478 = vmatprep.mubr.msk.f32.mxu1 %vm599_vm1, %v598_v0  ;;  %v539_v9 = vpack.c.bf16 %v113_v7, %v112_v6  ;;  %v116_v13 = vld [vmem:[%s808_s2 + $0x30] sm:$0xff]  ;;  %v117_v14 = vld [vmem:[%s808_s2 + $0x38] sm:$0xff] }
   0x4   :  { %v536_v8 = vpack.c.bf16 %v111_v5, %v110_v3  ;;  %559 = vmatprep.subr.bf16.mxu0 %v600_v4  ;;  %513 = vmatprep.mubr.msk.f32.mxu0 %vm599_vm1, %v598_v0  ;;  %v114_v10 = vld [vmem:[%s808_s2 + $0x20] sm:$0xff]  ;;  %v545_v15 = vpack.c.bf16 %v117_v14, %v116_v13  ;;  %v119_v17 = vld [vmem:[%s808_s2 + $0x48] sm:$0xff]  ;;  %v120_v19 = vld [vmem:[%s808_s2 + $0x50] sm:$0xff] }
   0x5   :  { %v542_v12 = vpack.c.bf16 %v115_v11, %v114_v10  ;;  %v118_v16 = vld [vmem:[%s808_s2 + $0x40] sm:$0xff]  ;;  %v121_v20 = vld [vmem:[%s808_s2 + $0x58] sm:$0xff]  ;;  %v123_v23 = vld [vmem:[%s808_s2 + $0x68] sm:$0xff] }
   0x6   :  { %537 = vmatpush3.bf16.msra.mxu1 %v536_v8  ;;  %v548_v18 = vpack.c.bf16 %v119_v17, %v118_v16  ;;  %v551_v21 = vpack.c.bf16 %v121_v20, %v120_v19  ;;  %v122_v22 = vld [vmem:[%s808_s2 + $0x60] sm:$0xff]  ;;  %v124_v25 = vld [vmem:[%s808_s2 + $0x70] sm:$0xff]  ;;  %v125_v26 = vld [vmem:[%s808_s2 + $0x78] sm:$0xff] }
   0x7   :  { %538 = vmatprep.subr.bf16.mxu1 %v600_v4  ;;  %v554_v24 = vpack.c.bf16 %v123_v23, %v122_v22  ;;  %v557_v27 = vpack.c.bf16 %v125_v26, %v124_v25  ;;  %v203_v28 = vld [vmem:[%s809_s3] sm:$0xff]  ;;  %v204_v29 = vld [vmem:[%s809_s3 + $0x8] sm:$0xff]  ;;  %v205_v30 = vld [vmem:[%s809_s3 + $0x10] sm:$0xff] }
   0x8   :  { %v560_v31 = vpack.c.bf16 %v204_v29, %v203_v28  ;;  %v206_v32 = vld [vmem:[%s809_s3 + $0x18] sm:$0xff]  ;;  %v207_v34 = vld [vmem:[%s809_s3 + $0x20] sm:$0xff]  ;;  %v208_v35 = vld [vmem:[%s809_s3 + $0x28] sm:$0xff] }
   0x9   :  { %v563_v33 = vpack.c.bf16 %v206_v32, %v205_v30  ;;  %v566_v36 = vpack.c.bf16 %v208_v35, %v207_v34  ;;  %v209_v37 = vld [vmem:[%s809_s3 + $0x30] sm:$0xff]  ;;  %v210_v38 = vld [vmem:[%s809_s3 + $0x38] sm:$0xff]  ;;  %v211_v40 = vld [vmem:[%s809_s3 + $0x40] sm:$0xff] }
   0xa   :  { %540 = vmatpush3.bf16.msra.mxu1 %v539_v9  ;;  %561 = vmatpush3.bf16.msra.mxu0 %v560_v31  ;;  %v569_v39 = vpack.c.bf16 %v210_v38, %v209_v37  ;;  %v212_v41 = vld [vmem:[%s809_s3 + $0x48] sm:$0xff]  ;;  %v213_v43 = vld [vmem:[%s809_s3 + $0x50] sm:$0xff]  ;;  %v214_v44 = vld [vmem:[%s809_s3 + $0x58] sm:$0xff] }
   0xb   :  { %541 = vmatprep.subr.bf16.mxu1 %v600_v4  ;;  %562 = vmatprep.subr.bf16.mxu0 %v600_v4  ;;  %v572_v42 = vpack.c.bf16 %v212_v41, %v211_v40  ;;  %v575_v45 = vpack.c.bf16 %v214_v44, %v213_v43  ;;  %v215_v46 = vld [vmem:[%s809_s3 + $0x60] sm:$0xff]  ;;  %v216_v47 = vld [vmem:[%s809_s3 + $0x68] sm:$0xff]  ;;  %v217_v54 = vld [vmem:[%s809_s3 + $0x70] sm:$0xff] }
   0xc   :  { %v578_v48 = vpack.c.bf16 %v216_v47, %v215_v46  ;;  %v390_v49 = vld [vmem:[%s810_s5] ss:$0 sm:$0xff]  ;;  %v218_v55 = vld [vmem:[%s809_s3 + $0x78] sm:$0xff]  ;;  %v297_v58 = vld [vmem:[%s811_s4 + $0x8] sm:$0xff] }
   0xd   :  { %v581_v56 = vpack.c.bf16 %v218_v55, %v217_v54  ;;  %v296_v57 = vld [vmem:[%s811_s4] sm:$0xff]  ;;  %v298_v59 = vld [vmem:[%s811_s4 + $0x10] sm:$0xff]  ;;  %v299_v61 = vld [vmem:[%s811_s4 + $0x18] sm:$0xff] }
   0xe   :  { %543 = vmatpush3.bf16.msra.mxu1 %v542_v12  ;;  %564 = vmatpush3.bf16.msra.mxu0 %v563_v33  ;;  %v584_v60 = vpack.c.bf16 %v297_v58, %v296_v57  ;;  %v587_v62 = vpack.c.bf16 %v299_v61, %v298_v59  ;;  %v300_v63 = vld [vmem:[%s811_s4 + $0x20] sm:$0xff]  ;;  %v302_v8 = vld [vmem:[%s811_s4 + $0x30] sm:$0xff]  ;;  %v303_v9 = vld [vmem:[%s811_s4 + $0x38] sm:$0xff] }
   0xf   :  { %544 = vmatprep.subr.bf16.mxu1 %v600_v4  ;;  %565 = vmatprep.subr.bf16.mxu0 %v600_v4  ;;  %v392_v2 = vld [vmem:[%s810_s5 + $0x1] ss:$0 sm:$0xff]  ;;  %v593_v10 = vpack.c.bf16 %v303_v9, %v302_v8 }
  0x12   :  { %546 = vmatpush3.bf16.msra.mxu1 %v545_v15  ;;  %567 = vmatpush3.bf16.msra.mxu0 %v566_v36  ;;  %v394_v15 = vld [vmem:[%s810_s5 + $0x3] ss:$0 sm:$0xff] }
  0x13   :  { %547 = vmatprep.subr.bf16.mxu1 %v600_v4  ;;  %568 = vmatprep.subr.bf16.mxu0 %v600_v4 }
  0x16   :  { %549 = vmatpush3.bf16.msra.mxu1 %v548_v18  ;;  %570 = vmatpush3.bf16.msra.mxu0 %v569_v39 }
  0x17   :  { %550 = vmatprep.subr.bf16.mxu1 %v600_v4  ;;  %571 = vmatprep.subr.bf16.mxu0 %v600_v4 }
  0x1a   :  { %552 = vmatpush3.bf16.msra.mxu1 %v551_v21  ;;  %573 = vmatpush3.bf16.msra.mxu0 %v572_v42 }
  0x1b   :  { %553 = vmatprep.subr.bf16.mxu1 %v600_v4  ;;  %574 = vmatprep.subr.bf16.mxu0 %v600_v4 }
  0x1e   :  { %555 = vmatpush3.bf16.msra.mxu1 %v554_v24  ;;  %576 = vmatpush3.bf16.msra.mxu0 %v575_v45 }
  0x1f   :  { %556 = vmatprep.subr.bf16.mxu1 %v600_v4  ;;  %577 = vmatprep.subr.bf16.mxu0 %v600_v4 }
  0x22   :  { %558 = vmatpush3.bf16.msra.mxu1 %v557_v27  ;;  %579 = vmatpush3.bf16.msra.mxu0 %v578_v48 }
  0x23   :  { %583 = vmatprep.subr.bf16.mxu1 %v600_v4  ;;  %580 = vmatprep.subr.bf16.mxu0 %v600_v4 }
  0x26   :  { %582 = vmatpush3.bf16.msra.mxu0 %v581_v56 }
  0xd6   :  { %v105_v50 = vpop.f32.mrb[0].mxu0 }
  0xd7   :  { %v106_v51 = vadd.f32 %v390_v49, %v105_v50  ;;  %v445_v52 = vpop.f32.mrb[1].mxu0 }
  0xd9   :  { %v109_v53 = vmax.f32 %v106_v51, 0.0 }
  0xdb   :  { %479 = vmatmul.mubr.f32.vlgmr.msra.gmra.mrb[0].mxu1 %v109_v53 }
  0xdc   :  { %532 = vmatprep.mubr.msk.f32.mxu1 %vm599_vm1, %v598_v0  ;;  %585 = vmatpush3.bf16.msra.mxu1 %v584_v60  ;;  %v301_v0 = vld [vmem:[%s811_s4 + $0x28] sm:$0xff] }
  0xdd   :  { %586 = vmatprep.subr.bf16.mxu1 %v600_v4  ;;  %v590_v1 = vpack.c.bf16 %v301_v0, %v300_v63 }
  0xe0   :  { %588 = vmatpush3.bf16.msra.mxu1 %v587_v62 }
  0xe1   :  { %589 = vmatprep.subr.bf16.mxu1 %v600_v4 }
  0xe4   :  { %591 = vmatpush3.bf16.msra.mxu1 %v590_v1 }
  0xe5   :  { %592 = vmatprep.subr.bf16.mxu1 %v600_v4  ;;  %v393_v4 = vld [vmem:[%s810_s5 + $0x2] ss:$0 sm:$0xff] }
  0xe8   :  { %594 = vmatpush3.bf16.msra.mxu1 %v593_v10 }
 0x1ae   :  { %v198_v3 = vpop.f32.mrb[0].mxu1 }
 0x1af   :  { %v199_v5 = vadd.f32 %v392_v2, %v198_v3  ;;  %v480_v6 = vpop.f32.mrb[1].mxu1 }
 0x1b1   :  { %v202_v7 = vmax.f32 %v199_v5, 0.0 }
 0x1b3   :  { %514 = vmatmul.mubr.f32.vlgmr.msra.gmra.mrb[2].mxu0 %v202_v7 }
 0x286   :  { %v291_v11 = vpop.f32.mrb[2].mxu0 }
 0x287   :  { %v292_v12 = vadd.f32 %v393_v4, %v291_v11  ;;  %v515_v13 = vpop.f32.mrb[3].mxu0 }
 0x289   :  { %v295_v14 = vmax.f32 %v292_v12, 0.0 }
 0x28b   :  { %533 = vmatmul.mubr.msk.f32.vlgmr.msra.gmra.mrb[2].mxu1 %vm310_vm2, %v295_v14 }
 0x35e   :  { %v380_v16 = vpop.f32.mrb[2].mxu1 }
 0x35f   :  { %v381_v17 = vadd.f32 %v394_v15, %v380_v16  ;;  %v534_v18 = vpop.f32.mrb[3].mxu1 }
 0x361   :  { %385 = vst.msk [vmem:[%s812_s6] sm:$0xff] %vm384_vm3, %v381_v17 }

</bundles_post_ra>
